<compile_context>
chip_gen: v7x
topology: tpu7x:2x2x1
jax: 0.10.0
libtpu: 0.0.40
codegen_flags: <defaults>
</compile_context>

<pallas_src>
import jax
import jax.numpy as jnp
from jax.experimental import pallas as pl
from jax.experimental.pallas import tpu as pltpu


def decoder_kernel(x_ref, we_ref, w1_ref, consts_ref, tgt_ref, out_ref):
    B = x_ref.shape[0]
    H2 = w1_ref.shape[1]          # 2 * (hidden // 4)
    h4 = H2 // 2

    # ---- unpack the packed constant slab (one small DMA instead of many) ----
    consts = consts_ref[...]      # [4, hidden]
    be = consts[0:1, :]           # encoder bias            [1, hidden]
    b1f = consts[1:2, 0:H2]       # fused head-1 biases     [1, 2*h4]
    w2f = consts[2:3, 0:H2]       # fused head-2 weights    [1, 2*h4]
    ba2 = consts[3:4, 0:1]        # atom head final bias    (1, 1)
    bb2 = consts[3:4, 1:2]        # bond head final bias    (1, 1)
    lw = consts[3:4, 2:4]         # loss_weight             (1, 2)

    # ---- encoder1 (modeled as a single Linear) ----
    emb1 = jnp.dot(x_ref[...], we_ref[...],
                   preferred_element_type=jnp.float32) + be

    # ---- fused two-head hidden layer: one matmul + one softplus ----
    h = jnp.dot(emb1, w1_ref[...], preferred_element_type=jnp.float32) + b1f
    h = jnp.logaddexp(h, 0.0)     # Softplus (beta=1), numerically stable, f32

    # ---- fused final Linear(h4 -> 1) for both heads:
    #      broadcast multiply + segmented lane reduce (no extra MXU pass) ----
    hw = h * w2f                                                   # [B, 2*h4]
    atom_pred = jnp.sum(hw[:, 0:h4], axis=-1, keepdims=True) + ba2  # [B, 1]
    bond_pred = jnp.sum(hw[:, h4:H2], axis=-1, keepdims=True) + bb2  # [B, 1]

    # ---- SmoothL1Loss(reduction='mean') / len(mol)  =>  sum(...) / B^2 ----
    def smooth_l1_sum(d):
        ad = jnp.abs(d)
        return jnp.sum(jnp.where(ad < 1.0, 0.5 * d * d, ad - 0.5))

    inv_n2 = 1.0 / float(B * B)
    atom_loss = jnp.reshape(
        smooth_l1_sum(atom_pred - tgt_ref[:, 0:1]) * inv_n2, (1, 1))
    bond_loss = jnp.reshape(
        smooth_l1_sum(bond_pred - tgt_ref[:, 1:2]) * inv_n2, (1, 1))

    # ---- two-way softmax over loss_weight, weighted sum (no concat) ----
    m = jnp.max(lw, axis=-1, keepdims=True)            # (1, 1)
    e = jnp.exp(lw - m)                                 # (1, 2)
    inv_s = 1.0 / jnp.sum(e, axis=-1, keepdims=True)    # (1, 1)
    w0 = e[:, 0:1] * inv_s
    w1 = e[:, 1:2] * inv_s
    out_ref[...] = atom_loss * w0 + bond_loss * w1


def atom_model_decoder(x, params, atom_target, bond_target, loss_weight):
    """Returns the scalar loss produced by Atom_Model_decoder.forward."""
    B = x.shape[0]
    H = params["we"].shape[1]
    h4 = params["wa1"].shape[1]
    H2 = 2 * h4
    assert H2 <= H and H >= 4  # packing layout requirement (h4 = H//4)

    # ---- host-side operand packing (done once, outside the kernel) ----
    w1f = jnp.concatenate([params["wa1"], params["wb1"]],
                          axis=1).astype(jnp.float32)              # [H, 2*h4]

    consts = jnp.zeros((4, H), jnp.float32)
    consts = consts.at[0, :].set(params["be"][0].astype(jnp.float32))
    consts = consts.at[1, :H2].set(
        jnp.concatenate([params["ba1"][0], params["bb1"][0]]).astype(jnp.float32))
    consts = consts.at[2, :H2].set(
        jnp.concatenate([params["wa2"][0], params["wb2"][0]]).astype(jnp.float32))
    consts = consts.at[3, 0].set(params["ba2"][0, 0].astype(jnp.float32))
    consts = consts.at[3, 1].set(params["bb2"][0, 0].astype(jnp.float32))
    consts = consts.at[3, 2:4].set(loss_weight.reshape(2).astype(jnp.float32))

    targets = jnp.stack(
        [atom_target.reshape(B), bond_target.reshape(B)],
        axis=1).astype(jnp.float32)                                # [B, 2]

    out = pl.pallas_call(
        decoder_kernel,
        out_shape=jax.ShapeDtypeStruct((1, 1), jnp.float32),
        in_specs=[pl.BlockSpec(memory_space=pltpu.MemorySpace.VMEM)] * 5,
        out_specs=pl.BlockSpec(memory_space=pltpu.MemorySpace.VMEM),
    )(x.astype(jnp.float32),
      params["we"].astype(jnp.float32),
      w1f,
      consts,
      targets)
    return out[0, 0]


def reference(x, params, atom_target, bond_target, loss_weight):
    """Pure-JAX reference of the same forward pass."""
    B = x.shape[0]
    emb1 = x @ params["we"] + params["be"]

    def head(w1, b1, w2, b2):
        h = jnp.logaddexp(emb1 @ w1 + b1, 0.0)
        return jnp.sum(h * w2, axis=-1, keepdims=True) + b2

    ap = head(params["wa1"], params["ba1"], params["wa2"], params["ba2"])
    bp = head(params["wb1"], params["bb1"], params["wb2"], params["bb2"])

    def sl1(p, t):
        d = p - t
        ad = jnp.abs(d)
        return jnp.mean(jnp.where(ad < 1.0, 0.5 * d * d, ad - 0.5))

    atom_loss = sl1(ap, atom_target.reshape(B, 1)) / B
    bond_loss = sl1(bp, bond_target.reshape(B, 1)) / B
    w = jax.nn.softmax(loss_weight)
    return atom_loss * w[0] + bond_loss * w[1]


def init_params(key, d_in, hidden):
    h4 = hidden // 4
    ks = jax.random.split(key, 11)
    u = lambda k, shape, scale: jax.random.uniform(
        k, shape, jnp.float32, -scale, scale)
    return {
        # encoder1 (Linear d_in -> hidden)
        "we": u(ks[0], (d_in, hidden), 1.0 / jnp.sqrt(d_in)),
        "be": u(ks[1], (1, hidden), 1.0 / jnp.sqrt(d_in)),
        # atom_num_s
        "wa1": u(ks[2], (hidden, h4), 1.0 / jnp.sqrt(hidden)),
        "ba1": u(ks[3], (1, h4), 1.0 / jnp.sqrt(hidden)),
        "wa2": u(ks[4], (1, h4), 1.0 / jnp.sqrt(h4)),
        "ba2": u(ks[5], (1, 1), 1.0 / jnp.sqrt(h4)),
        # bond_num_s
        "wb1": u(ks[6], (hidden, h4), 1.0 / jnp.sqrt(hidden)),
        "bb1": u(ks[7], (1, h4), 1.0 / jnp.sqrt(hidden)),
        "wb2": u(ks[8], (1, h4), 1.0 / jnp.sqrt(h4)),
        "bb2": u(ks[9], (1, 1), 1.0 / jnp.sqrt(h4)),
    }


if __name__ == "__main__":
    B, D_IN, HIDDEN = 8, 16, 32

    key = jax.random.PRNGKey(0)
    k_x, k_p, k_at, k_bt, k_lw = jax.random.split(key, 5)

    x = jax.random.normal(k_x, (B, D_IN), jnp.float32)          # mol features
    params = init_params(k_p, D_IN, HIDDEN)
    atom_target = jax.random.randint(k_at, (B,), 5, 30).astype(jnp.float32)
    bond_target = jax.random.randint(k_bt, (B,), 5, 40).astype(jnp.float32)
    # torch.rand(2) equivalent (deterministic here)
    loss_weight = jax.random.uniform(k_lw, (2,), jnp.float32)

    loss = atom_model_decoder(x, params, atom_target, bond_target, loss_weight)
    loss = jax.block_until_ready(loss)

    ref = reference(x, params, atom_target, bond_target, loss_weight)
    assert jnp.allclose(loss, ref, rtol=1e-5, atol=1e-5), (loss, ref)
    print("KERNEL_OK")
</pallas_src>

<mosaic_0001>
module attributes {stable_mosaic.version = 11 : i64} {
  func.func @decoder_kernel(%arg0: memref<8x16xf32, #tpu.memory_space<vmem>>, %arg1: memref<16x32xf32, #tpu.memory_space<vmem>>, %arg2: memref<32x16xf32, #tpu.memory_space<vmem>>, %arg3: memref<4x32xf32, #tpu.memory_space<vmem>>, %arg4: memref<8x2xf32, #tpu.memory_space<vmem>>, %arg5: memref<1x1xf32, #tpu.memory_space<vmem>>) attributes {dimension_semantics = [], scalar_prefetch = 0 : i64, scratch_operands = 0 : i64, tpu.core_type = #tpu.core_type<tc>} {
    %c0 = arith.constant 0 : index
    %c0_0 = arith.constant 0 : index
    %0 = vector.load %arg3[%c0, %c0_0] : memref<4x32xf32, #tpu.memory_space<vmem>>, vector<4x32xf32>
    %1 = vector.extract_strided_slice %0 {offsets = [0, 0], sizes = [1, 32], strides = [1, 1]} : vector<4x32xf32> to vector<1x32xf32>
    %2 = vector.extract_strided_slice %0 {offsets = [1, 0], sizes = [1, 16], strides = [1, 1]} : vector<4x32xf32> to vector<1x16xf32>
    %3 = vector.extract_strided_slice %0 {offsets = [2, 0], sizes = [1, 16], strides = [1, 1]} : vector<4x32xf32> to vector<1x16xf32>
    %4 = vector.extract_strided_slice %0 {offsets = [3, 0], sizes = [1, 1], strides = [1, 1]} : vector<4x32xf32> to vector<1x1xf32>
    %5 = vector.extract_strided_slice %0 {offsets = [3, 1], sizes = [1, 1], strides = [1, 1]} : vector<4x32xf32> to vector<1x1xf32>
    %6 = vector.extract_strided_slice %0 {offsets = [3, 2], sizes = [1, 2], strides = [1, 1]} : vector<4x32xf32> to vector<1x2xf32>
    %c0_1 = arith.constant 0 : index
    %c0_2 = arith.constant 0 : index
    %7 = vector.load %arg0[%c0_1, %c0_2] : memref<8x16xf32, #tpu.memory_space<vmem>>, vector<8x16xf32>
    %c0_3 = arith.constant 0 : index
    %c0_4 = arith.constant 0 : index
    %8 = vector.load %arg1[%c0_3, %c0_4] : memref<16x32xf32, #tpu.memory_space<vmem>>, vector<16x32xf32>
    %cst = arith.constant dense<0.000000e+00> : vector<8x32xf32>
    %9 = tpu.matmul %7, %8, %cst {dimension_numbers = #tpu.dot_dimension_numbers<[1], [0], [0], [1], [0, 0, 1, 1], [], []>} : vector<8x16xf32>, vector<16x32xf32>, vector<8x32xf32> -> vector<8x32xf32>
    %10 = vector.broadcast %1 : vector<1x32xf32> to vector<8x32xf32>
    %11 = arith.addf %9, %10 : vector<8x32xf32>
    %c0_5 = arith.constant 0 : index
    %c0_6 = arith.constant 0 : index
    %12 = vector.load %arg2[%c0_5, %c0_6] : memref<32x16xf32, #tpu.memory_space<vmem>>, vector<32x16xf32>
    %cst_7 = arith.constant dense<0.000000e+00> : vector<8x16xf32>
    %13 = tpu.matmul %11, %12, %cst_7 {dimension_numbers = #tpu.dot_dimension_numbers<[1], [0], [0], [1], [0, 0, 1, 1], [], []>} : vector<8x32xf32>, vector<32x16xf32>, vector<8x16xf32> -> vector<8x16xf32>
    %14 = vector.broadcast %2 : vector<1x16xf32> to vector<8x16xf32>
    %15 = arith.addf %13, %14 : vector<8x16xf32>
    %cst_8 = arith.constant 0.000000e+00 : f32
    %16 = vector.broadcast %cst_8 : f32 to vector<8x16xf32>
    %17 = arith.maximumf %15, %16 : vector<8x16xf32>
    %18 = vector.broadcast %cst_8 : f32 to vector<8x16xf32>
    %19 = arith.subf %15, %18 : vector<8x16xf32>
    %20 = arith.cmpf one, %19, %19 : vector<8x16xf32>
    %21 = vector.broadcast %cst_8 : f32 to vector<8x16xf32>
    %22 = arith.addf %15, %21 : vector<8x16xf32>
    %23 = math.absf %19 : vector<8x16xf32>
    %cst_9 = arith.constant 0.000000e+00 : f32
    %24 = vector.broadcast %cst_9 : f32 to vector<8x16xf32>
    %25 = arith.subf %24, %23 : vector<8x16xf32>
    %26 = math.exp %25 : vector<8x16xf32>
    %27 = math.log1p %26 : vector<8x16xf32>
    %28 = arith.addf %17, %27 : vector<8x16xf32>
    %29 = arith.select %20, %22, %28 : vector<8x16xi1>, vector<8x16xf32>
    %30 = vector.broadcast %3 : vector<1x16xf32> to vector<8x16xf32>
    %31 = arith.mulf %29, %30 : vector<8x16xf32>
    %32 = vector.extract_strided_slice %31 {offsets = [0, 0], sizes = [8, 8], strides = [1, 1]} : vector<8x16xf32> to vector<8x8xf32>
    %cst_10 = arith.constant dense<0.000000e+00> : vector<8xf32>
    %33 = vector.multi_reduction <add>, %32, %cst_10 [1] : vector<8x8xf32> to vector<8xf32>
    %34 = vector.shape_cast %33 : vector<8xf32> to vector<8x1xf32>
    %35 = vector.broadcast %4 : vector<1x1xf32> to vector<8x1xf32>
    %36 = arith.addf %34, %35 : vector<8x1xf32>
    %37 = vector.extract_strided_slice %31 {offsets = [0, 8], sizes = [8, 8], strides = [1, 1]} : vector<8x16xf32> to vector<8x8xf32>
    %cst_11 = arith.constant dense<0.000000e+00> : vector<8xf32>
    %38 = vector.multi_reduction <add>, %37, %cst_11 [1] : vector<8x8xf32> to vector<8xf32>
    %39 = vector.shape_cast %38 : vector<8xf32> to vector<8x1xf32>
    %40 = vector.broadcast %5 : vector<1x1xf32> to vector<8x1xf32>
    %41 = arith.addf %39, %40 : vector<8x1xf32>
    %c0_12 = arith.constant 0 : index
    %c0_13 = arith.constant 0 : index
    %42 = vector.load %arg4[%c0_12, %c0_13] : memref<8x2xf32, #tpu.memory_space<vmem>>, vector<8x1xf32>
    %43 = arith.subf %36, %42 : vector<8x1xf32>
    %44 = math.absf %43 : vector<8x1xf32>
    %cst_14 = arith.constant 1.000000e+00 : f32
    %45 = vector.broadcast %cst_14 : f32 to vector<8x1xf32>
    %46 = arith.cmpf olt, %44, %45 : vector<8x1xf32>
    %cst_15 = arith.constant 5.000000e-01 : f32
    %47 = vector.broadcast %cst_15 : f32 to vector<8x1xf32>
    %48 = arith.mulf %47, %43 : vector<8x1xf32>
    %49 = arith.mulf %48, %43 : vector<8x1xf32>
    %cst_16 = arith.constant 5.000000e-01 : f32
    %50 = vector.broadcast %cst_16 : f32 to vector<8x1xf32>
    %51 = arith.subf %44, %50 : vector<8x1xf32>
    %52 = arith.select %46, %49, %51 : vector<8x1xi1>, vector<8x1xf32>
    %53 = vector.shape_cast %52 : vector<8x1xf32> to vector<1x8x1xf32>
    %cst_17 = arith.constant dense<0.000000e+00> : vector<1xf32>
    %54 = vector.multi_reduction <add>, %53, %cst_17 [1, 2] : vector<1x8x1xf32> to vector<1xf32>
    %55 = vector.shape_cast %54 : vector<1xf32> to vector<1x1x1xf32>
    %56 = vector.extract %55[0, 0, 0] : f32 from vector<1x1x1xf32>
    %cst_18 = arith.constant 1.562500e-02 : f32
    %57 = arith.mulf %56, %cst_18 : f32
    %58 = vector.broadcast %57 : f32 to vector<1x1xf32>
    %c0_19 = arith.constant 0 : index
    %c1 = arith.constant 1 : index
    %59 = vector.load %arg4[%c0_19, %c1] : memref<8x2xf32, #tpu.memory_space<vmem>>, vector<8x1xf32>
    %60 = arith.subf %41, %59 : vector<8x1xf32>
    %61 = math.absf %60 : vector<8x1xf32>
    %cst_20 = arith.constant 1.000000e+00 : f32
    %62 = vector.broadcast %cst_20 : f32 to vector<8x1xf32>
    %63 = arith.cmpf olt, %61, %62 : vector<8x1xf32>
    %cst_21 = arith.constant 5.000000e-01 : f32
    %64 = vector.broadcast %cst_21 : f32 to vector<8x1xf32>
    %65 = arith.mulf %64, %60 : vector<8x1xf32>
    %66 = arith.mulf %65, %60 : vector<8x1xf32>
    %cst_22 = arith.constant 5.000000e-01 : f32
    %67 = vector.broadcast %cst_22 : f32 to vector<8x1xf32>
    %68 = arith.subf %61, %67 : vector<8x1xf32>
    %69 = arith.select %63, %66, %68 : vector<8x1xi1>, vector<8x1xf32>
    %70 = vector.shape_cast %69 : vector<8x1xf32> to vector<1x8x1xf32>
    %cst_23 = arith.constant dense<0.000000e+00> : vector<1xf32>
    %71 = vector.multi_reduction <add>, %70, %cst_23 [1, 2] : vector<1x8x1xf32> to vector<1xf32>
    %72 = vector.shape_cast %71 : vector<1xf32> to vector<1x1x1xf32>
    %73 = vector.extract %72[0, 0, 0] : f32 from vector<1x1x1xf32>
    %cst_24 = arith.constant 1.562500e-02 : f32
    %74 = arith.mulf %73, %cst_24 : f32
    %75 = vector.broadcast %74 : f32 to vector<1x1xf32>
    %cst_25 = arith.constant dense<0xFF800000> : vector<1xf32>
    %76 = vector.multi_reduction <maximumf>, %6, %cst_25 [1] : vector<1x2xf32> to vector<1xf32>
    %77 = vector.shape_cast %76 : vector<1xf32> to vector<1x1xf32>
    %78 = vector.broadcast %77 : vector<1x1xf32> to vector<1x2xf32>
    %79 = arith.subf %6, %78 : vector<1x2xf32>
    %80 = math.exp %79 : vector<1x2xf32>
    %cst_26 = arith.constant dense<0.000000e+00> : vector<1xf32>
    %81 = vector.multi_reduction <add>, %80, %cst_26 [1] : vector<1x2xf32> to vector<1xf32>
    %82 = vector.shape_cast %81 : vector<1xf32> to vector<1x1xf32>
    %cst_27 = arith.constant 1.000000e+00 : f32
    %83 = vector.broadcast %cst_27 : f32 to vector<1x1xf32>
    %84 = arith.divf %83, %82 : vector<1x1xf32>
    %85 = vector.extract_strided_slice %80 {offsets = [0, 0], sizes = [1, 1], strides = [1, 1]} : vector<1x2xf32> to vector<1x1xf32>
    %86 = arith.mulf %85, %84 : vector<1x1xf32>
    %87 = vector.extract_strided_slice %80 {offsets = [0, 1], sizes = [1, 1], strides = [1, 1]} : vector<1x2xf32> to vector<1x1xf32>
    %88 = arith.mulf %87, %84 : vector<1x1xf32>
    %89 = arith.mulf %58, %86 : vector<1x1xf32>
    %90 = arith.mulf %75, %88 : vector<1x1xf32>
    %91 = arith.addf %89, %90 : vector<1x1xf32>
    %c0_28 = arith.constant 0 : index
    %c0_29 = arith.constant 0 : index
    %92 = vector.load %arg5[%c0_28, %c0_29] : memref<1x1xf32, #tpu.memory_space<vmem>>, vector<1x1xf32>
    tpu.vector_store %arg5[%c0_28, %c0_29], %91 {strides = array<i32>} : memref<1x1xf32, #tpu.memory_space<vmem>>, vector<1x1xf32>,
    return
  }
}

</mosaic_0001>

<bundles_post_ra>
// kernel: tpu_custom_call.1
= control target key start
LH: loop header
LB: loop body
LE: loop exit
PB: predicated region body
PF: predicated region fallthrough
CT: control target
= control target key end

     0   :  { %v396_v2 = vmov 0.0|0.0   ;;  %vm397_vm0 = vmmov 0   ;;  %v398_v4 = vmov 0.0   ;;  %s476_s0 = inlined_call_operand.vmem [shape: f32[8,16], index: 0, kind: input, shape index: {}]   ;;  %s477_s1 = inlined_call_operand.vmem [shape: f32[16,32], index: 1, kind: input, shape index: {}]   ;;  %s478_s2 = inlined_call_operand.vmem [shape: f32[32,16], index: 2, kind: input, shape index: {}]   ;;  %s479_s3 = inlined_call_operand.vmem [shape: f32[4,32], index: 3, kind: input, shape index: {}]   ;;  %s480_s4 = inlined_call_operand.vmem [shape: f32[8,2], index: 4, kind: input, shape index: {}]   ;;  %s481_s5 = inlined_call_operand.hbm [shape: f32[1,1], index: 5, kind: output, shape index: {}]  }
   0x1   :  { %v23_v0 = vld [vmem:[%s477_s1] sm:$0xff]  ;;  %v24_v1 = vld [vmem:[%s477_s1 + $0x8] sm:$0xff]  ;;  %344 = vmatprep.subr.bf16.mxu0 %v396_v2  ;;  %330 = vmatprep.mubr.msk.f32.mxu0 %vm397_vm0, %v398_v4 }
   0x2   :  { %v345_v3 = vpack.c.bf16 %v24_v1, %v23_v0  ;;  %v103_v5 = vld [vmem:[%s478_s2] sm:$0xff]  ;;  %v104_v6 = vld [vmem:[%s478_s2 + $0x8] sm:$0xff]  ;;  %347 = vmatprep.subr.bf16.mxu1 %v396_v2  ;;  %341 = vmatprep.mubr.msk.f32.mxu1 %vm397_vm0, %v398_v4 }
   0x3   :  { %v348_v7 = vpack.c.bf16 %v104_v6, %v103_v5 }
   0x4   :  { %10 = vsyncpa [#allocation3], 0  ;;  %346 = vmatpush3.bf16.msra.mxu0 %v345_v3  ;;  %v22_v8 = vld [vmem:[%s476_s0] sm:$0xff]  ;;  %vm29_vm1 = vcmask 130048   ;;  %v105_v9 = vld [vmem:[%s478_s2 + $0x10] sm:$0xff]  ;;  %v25_v12 = vlaneseq  ;;  %vm111_vm2 = vcmask 261120  }
   0x5   :  { %349 = vmatpush3.bf16.msra.mxu1 %v348_v7  ;;  %v106_v10 = vld [vmem:[%s478_s2 + $0x18] sm:$0xff]  ;;  %v21_v15 = vld [vmem:[%s479_s3] sm:$0xf]  ;;  %vm269_vm3 = vcmask 27667   ;;  %vm208_vm6 = vcmask 64512   ;;  %s399_s0 = smov 120  }
   0x6   :  { %350 = vmatprep.subr.bf16.mxu1 %v396_v2  ;;  %v351_v11 = vpack.c.bf16 %v106_v10, %v105_v9  ;;  %v26_v13 = vshrl.u32 %v25_v12, 7  ;;  %v270_v20 = vsel %vm269_vm3, %v21_v15, -inf  ;;  %v225_v54 = vld [vmem:[%s480_s4] sm:$0xff]  ;;  %s400_s8 = smov 127   ;;  %s401_s9 = smov 126   ;;  %vm233_vm9 = vcmask 7168  }
   0x7   :  { %331 = vmatmul.mubr.msk.f32.vlgmr.msra.gmra.mrb[0].mxu0 %vm29_vm1, %v22_v8  ;;  %271 = vmax.xlane.f32.xlu1 %v270_v20  ;;  %vm280_vm10 = vcmask 11267   ;;  %s402_s13 = smov [#allocation2]   ;;  %vm298_vm11 = vcmask 3075  }
   0x8   :  { %v27_v14 = vsub.s32 0, %v26_v13  ;;  %v109_v21 = vsub.s32 1, %v26_v13  ;;  %v205_v34 = vsub.s32 2, %v26_v13  ;;  %v214_v49 = vsub.s32 3, %v26_v13  ;;  %s306_s14 = sshll.u32 %s402_s13, 4  ;;  %s307_s14 = int_to_ptr.vmem [resolvable:$true] %s306_s14 }
   0x9   :  { %352 = vmatpush3.bf16.msra.mxu1 %v351_v11  ;;  %s372_s15 = scalar_lea.vmem %s307_s14, 16  ;;  %s376_s16 = scalar_lea.vmem %s307_s14, 32 }
   0xa   :  { %v28_v16 = vrot.slane %v21_v15, %v27_v14  ;;  %v110_v22 = vrot.slane %v21_v15, %v109_v21  ;;  %v206_v40 = vrot.slane %v21_v15, %v205_v34  ;;  %v215_v51 = vrot.slane %v21_v15, %v214_v49  ;;  %p373_p0 = scmp.ne.s32.totalorder %s307_s14, %s372_s15  ;;  %p377_p1 = scmp.lt.s32.totalorder %s307_s14, %s307_s14 }
   0xb   :  { %p378_p2 = scmp.lt.s32.totalorder %s376_s16, %s372_s15 }
   0xd   :  { %p379_p3 = por %p378_p2, %p377_p1 }
   0xf   :  { %p380_p4 = pnand %p379_p3, %p373_p0 }
  0x94   :  { %v272_v47 = vpop.xlane.xlu1 %271 }
  0x95   :  { %v273_v48 = vsub.f32 %v21_v15, %v272_v47 }
  0x97   :  { %v274_v50 = vmul.f32 1.442695, %v273_v48 }
  0xda   :  { %v99_v17 = vpop.f32.mrb[0].mxu0 }
  0xdb   :  { %v100_v18 = vadd.f32 %v99_v17, %v28_v16  ;;  %v332_v19 = vpop.f32.mrb[1].mxu0 }
  0xdd   :  { %342 = vmatmul.mubr.msk.f32.vlgmr.msra.gmra.mrb[0].mxu1 %vm111_vm2, %v100_v18 }
 0x1b0   :  { %v181_v23 = vpop.f32.mrb[0].mxu1 }
 0x1b1   :  { %v182_v24 = vadd.f32 %v181_v23, %v110_v22  ;;  %v343_v25 = vpop.f32.mrb[1].mxu1 }
 0x1b3   :  { %v188_v26 = vand.u32 2147483647, %v182_v24  ;;  %v185_v38 = vmax.f32 %v182_v24, 0.0  ;;  %vm186_vm5 = vcmp.ne.f32.partialorder %v182_v24, %v182_v24 }
 0x1b5   :  { %v189_v27 = vsub.f32 0.0, %v188_v26 }
 0x1b7   :  { %v190_v28 = vmul.f32 1.442695, %v189_v27 }
 0x1b9   :  { %364 = vpow2.f32 %v190_v28 }
 0x1c3   :  { %v365_v29 = vpop.eup %364 }
 0x1c4   :  { %v192_v30 = vadd.f32 1.0, %v365_v29  ;;  %v195_v31 = vmul.f32 -0.5, %v365_v29  ;;  %v198_v33 = vand.u32 2147483647, %v365_v29 }
 0x1c6   :  { %366 = vlog2.f32 %v192_v30  ;;  %v196_v32 = vadd.f32 1.0, %v195_v31  ;;  %vm199_vm4 = vcmp.lt.f32.partialorder %v198_v33, 0.0004427343 }
 0x1c7   :  { %368 = vpow2.f32 %v274_v50 }
 0x1c8   :  { %v197_v37 = vmul.f32 %v365_v29, %v196_v32 }
 0x1d0   :  { %v367_v35 = vpop.eup %366 }
 0x1d1   :  { %v194_v36 = vmul.f32 0.6931472, %v367_v35  ;;  %v369_v61 = vpop.eup %368 }
 0x1d3   :  { %v200_v39 = vsel %vm199_vm4, %v197_v37, %v194_v36 }
 0x1d4   :  { %v201_v41 = vadd.f32 %v200_v39, %v185_v38 }
 0x1d6   :  { %v202_v42 = vsel %vm186_vm5, %v182_v24, %v201_v41 }
 0x1d7   :  { %v207_v43 = vmul.f32 %v206_v40, %v202_v42 }
 0x1d9   :  { %218 = vrot.lane.b32.xlu0 %v207_v43, %s399_s0  ;;  %v209_v44 = vsel %vm208_vm6, %v207_v43, 0.0 }
 0x1da   :  { %210 = vadd.xlane.f32.xlu1 %v209_v44 }
 0x24b   :  { %v219_v45 = vpop.permute.xlu0 %218 }
 0x24c   :  { %v221_v46 = vsel %vm208_vm6, %v219_v45, 0.0 }
 0x24d   :  { %222 = vadd.xlane.f32.xlu0 %v221_v46 }
 0x267   :  { %v211_v62 = vpop.xlane.xlu1 %210 }
 0x268   :  { %v216_v63 = vadd.f32 %v215_v51, %v211_v62 }
 0x26a   :  { %v226_v0 = vsub.f32 %v216_v63, %v225_v54 }
 0x26c   :  { %v229_v1 = vmul.f32 0.5, %v226_v0  ;;  %v227_v2 = vand.u32 2147483647, %v226_v0 }
 0x26e   :  { %v230_v3 = vmul.f32 %v229_v1, %v226_v0  ;;  %v316_v4 = vadd.f32 -0.5, %v227_v2  ;;  %vm228_vm8 = vcmp.lt.f32.partialorder %v227_v2, 1.0 }
 0x270   :  { %v232_v5 = vsel %vm228_vm8, %v230_v3, %v316_v4 }
 0x271   :  { %v234_v6 = vsel %vm233_vm9, %v232_v5, 0.0 }
 0x2da   :  { %v223_v52 = vpop.xlane.xlu0 %222 }
 0x2db   :  { %v224_v53 = vadd.f32 %v223_v52, %v215_v51 }
 0x2dd   :  { %v246_v55 = vsub.f32 %v224_v53, %v225_v54 }
 0x2df   :  { %v249_v56 = vmul.f32 0.5, %v246_v55  ;;  %v247_v57 = vand.u32 2147483647, %v246_v55 }
 0x2e1   :  { %vm248_vm7 = vcmp.lt.f32.partialorder %v247_v57, 1.0  ;;  %v250_v58 = vmul.f32 %v249_v56, %v246_v55  ;;  %v317_v59 = vadd.f32 -0.5, %v247_v57 }
 0x2e3   :  { %v252_v60 = vsel %vm248_vm7, %v250_v58, %v317_v59 }
 0x2e4   :  { %254 = vrot.lane.b32.xlu1 %v252_v60, %s400_s8 }
 0x2e8   :  { %277 = vrot.lane.b32.xlu1 %v369_v61, %s401_s9 }
 0x30c   :  { %235 = vadd.xlane.f32.xlu1 %v234_v6 }
 0x356   :  { %v255_v7 = vpop.permute.xlu1 %254 }
 0x357   :  { %v257_v8 = vsel %vm233_vm9, %v255_v7, 0.0 }
 0x358   :  { %258 = vadd.xlane.f32.xlu0 %v257_v8 }
 0x35a   :  { %v278_v9 = vpop.permute.xlu1 %277 }
 0x35b   :  { %v281_v10 = vsel %vm280_vm10, %v278_v9, 0.0 }
 0x35c   :  { %282 = vadd.xlane.f32.xlu0 %v281_v10 }
 0x399   :  { %v236_v11 = vpop.xlane.xlu1 %235 }
 0x39a   :  { %v237_v12 = vrot.slane %v236_v11, 4 }
 0x39c   :  { %v238_v13 = vadd.f32 %v237_v12, %v236_v11 }
 0x39e   :  { %v239_v14 = vrot.slane %v238_v13, 2 }
 0x3a0   :  { %v240_v15 = vadd.f32 %v239_v14, %v238_v13 }
 0x3a2   :  { %v241_v16 = vrot.slane %v240_v15, 1 }
 0x3a4   :  { %v242_v17 = vadd.f32 %v241_v16, %v240_v15 }
 0x3a6   :  { %353 = vpush %v242_v17 }
 0x3d7   :  { %s354_s4 = spop %353 }
 0x3d8   :  { %s244_s12 = smul.f32 0.015625, %s354_s4 }
 0x3da   :  { %v245_v30 = vstv %s244_s12 }
 0x3e5   :  { %v259_v18 = vpop.xlane.xlu0 %258 }
 0x3e6   :  { %v260_v19 = vrot.slane %v259_v18, 4 }
 0x3e8   :  { %v261_v20 = vadd.f32 %v260_v19, %v259_v18 }
 0x3e9   :  { %v283_v25 = vpop.xlane.xlu0 %282 }
 0x3ea   :  { %v262_v21 = vrot.slane %v261_v20, 2  ;;  %370 = vrcp.f32 %v283_v25 }
 0x3ec   :  { %v263_v22 = vadd.f32 %v262_v21, %v261_v20 }
 0x3ee   :  { %v264_v23 = vrot.slane %v263_v22, 1 }
 0x3f0   :  { %v265_v24 = vadd.f32 %v264_v23, %v263_v22 }
 0x3f2   :  { %355 = vpush %v265_v24 }
 0x3f4   :  { %v371_v26 = vpop.eup %370 }
 0x3f5   :  { %v286_v27 = vmul.f32 %v371_v26, %v369_v61 }
 0x3f7   :  { %v287_v31 = vmul.f32 %v286_v27, %v245_v30 }
 0x423   :  { %s356_s10 = spop %355 }
 0x424   :  { %s267_s11 = smul.f32 0.015625, %s356_s10 }
 0x426   :  { %v268_v28 = vstv %s267_s11 }
 0x427   :  { %v288_v29 = vmul.f32 %v286_v27, %v268_v28 }
 0x429   :  { %290 = vrot.lane.b32.xlu0 %v288_v29, %s400_s8 }
 0x49b   :  { %v291_v32 = vpop.permute.xlu0 %290 }
 0x49c   :  { %v293_v33 = vadd.f32 %v291_v32, %v287_v31 }
 0x49e   :  { %295 = vrot.lane.b32.xlu0 %v293_v33, %s401_s9 }
 0x510   :  { %v296_v34 = vpop.permute.xlu0 %295 }
 0x511   :  { %299 = vst.msk [vmem:[#allocation2 - $0x3] sm:$0x8] %vm298_vm11, %v296_v34 }
 0x512   :  { %383 = shalt.err (!%p380_p4)
}
 0x513   :  { %s384_s19 = scalar_lea.hbm %s481_s5, 16 }
 0x514   :  { %p385_p5 = scmp.ne.s32.totalorder %s481_s5, %s384_s19  ;;  %p388_p6 = scmp.lt.u32.totalorder %s384_s19, %s481_s5 }
 0x516   :  { %p390_p7 = pnand %p388_p6, %p385_p5 }
 0x518   :  { %393 = shalt.err (!%p390_p7)
}
 0x519   :  { %309 = dma.vmem_to_hbm [thread:$0]  %s307_s14, 16, %s481_s5, [#allocation3]  }
 0x51a   :  { %394 = dma.done.wait [#allocation3], 16  }
 0x51b   :  { %395 = vsyncadd [#allocation3], 4294967280 }
 0x51c   :  { %313 = vsyncpa [#allocation3], 1 }

</bundles_post_ra>
